<compile_context>
chip_gen: v7x
topology: tpu7x:2x2x1
jax: 0.10.0
libtpu: 0.0.40
codegen_flags: <defaults>
</compile_context>

<pallas_src>
import jax
import jax.numpy as jnp
from jax.experimental import pallas as pl
from jax.experimental.pallas import tpu as pltpu

EPSILON = 1e-6


def layernorm_kernel(alpha_ref, bias_ref, x_ref, o_ref):
    # alpha_ref, bias_ref: (1,) scalars in SMEM.
    # x_ref, o_ref: (ROW_TILE, H) tiles in VMEM; reduce over the lane axis.
    x = x_ref[...].astype(jnp.float32)
    n = x.shape[-1]
    denom = max(n - 1, 1)  # torch.std default is unbiased (n-1); guard H==1
    mean = jnp.mean(x, axis=-1, keepdims=True)
    diff = x - mean
    var = jnp.sum(diff * diff, axis=-1, keepdims=True) * (1.0 / denom)
    std = jnp.sqrt(var)
    # Exact divide: kernel is HBM-bound, so this costs zero wall time and
    # avoids the accuracy loss of the approximate EUP reciprocal.
    scale = alpha_ref[0].astype(jnp.float32) / (std + EPSILON)   # (R, 1)
    shift = bias_ref[0].astype(jnp.float32) - mean * scale       # (R, 1)
    # Epilogue uses x (not diff), so the full-tile f32 `diff` temporary only
    # needs to live through the variance reduction.
    o_ref[...] = (x * scale + shift).astype(o_ref.dtype)


def _round_up(a, m):
    return ((a + m - 1) // m) * m


def _sublane_multiple(dtype):
    # Native packed tile height: 8 for f32, 16 for bf16, 32 for int8/fp8.
    itemsize = jnp.dtype(dtype).itemsize
    return max(8, 32 // max(itemsize, 1))


def _auto_row_tile(rows, h, dtype, target_tile_bytes):
    """Rows per grid step: ~target_tile_bytes per streamed tile (bytes-based,
    no row cap), dtype-aware sublane multiple, and >= 2 grid steps whenever
    there is enough work so v7x's second TensorCore is not idle."""
    itemsize = jnp.dtype(dtype).itemsize
    sub = _sublane_multiple(dtype)
    t = max(sub, target_tile_bytes // max(h * itemsize, 1))
    if rows >= 2 * sub:
        # Cap at ~half the (sublane-rounded) rows -> grid length >= 2.
        half = pl.cdiv(rows, 2 * sub) * sub
        t = min(t, half)
    t = min(t, _round_up(rows, sub))
    t = max(sub, (t // sub) * sub)
    return int(t)


def layer_normalization(x, alpha, bias, *, row_tile=None,
                        target_tile_bytes=4 * 1024 * 1024):
    """x: (..., H). alpha, bias: shape (1,) scalar parameters.

    Matches the PyTorch module: unbiased std (n-1), eps added to std (outside
    the sqrt). Keep x in its HBM dtype (e.g. bf16); the kernel upcasts to f32
    internally, so do NOT pre-cast to f32 in the caller.
    """
    # TODO(synk): for production shapes with H < 128 (or H not a multiple of
    # 128) a lane-dense repack (k = 128 // H rows per lane group + segmented
    # reduction) would avoid masked vst partial stores; no-op for H=768/4096.
    orig_shape = x.shape
    h = orig_shape[-1]
    x2d = x.reshape(-1, h)
    rows = x2d.shape[0]
    itemsize = jnp.dtype(x2d.dtype).itemsize

    if row_tile is None:
        row_tile = _auto_row_tile(rows, h, x2d.dtype, target_tile_bytes)

    # Ragged row counts: grid = cdiv and let Pallas handle the partial last
    # block. Each row's normalization is independent, and out-of-bounds rows
    # in the last block are never written back, so no host-side pad/slice
    # (which would re-read/re-write the whole tensor in HBM) is needed.
    grid = (pl.cdiv(rows, row_tile),)

    out = pl.pallas_call(
        layernorm_kernel,
        out_shape=jax.ShapeDtypeStruct((rows, h), x.dtype),
        grid_spec=pltpu.PrefetchScalarGridSpec(
            num_scalar_prefetch=0,
            grid=grid,
            in_specs=[
                pl.BlockSpec(memory_space=pltpu.MemorySpace.SMEM),  # alpha
                pl.BlockSpec(memory_space=pltpu.MemorySpace.SMEM),  # bias
                pl.BlockSpec((row_tile, h), lambda i: (i, 0)),
            ],
            out_specs=pl.BlockSpec((row_tile, h), lambda i: (i, 0)),
        ),
        compiler_params=pltpu.CompilerParams(
            # Independent row tiles -> shard grid across TensorCores (v7x).
            dimension_semantics=("parallel",),
            # 2x(in)+2x(out) pipeline buffers + f32 intermediates for ~4 MiB
            # tiles stay well under this; 48 MiB leaves headroom inside v7x's
            # 64 MiB physical VMEM and is trivially fine on v5e/v6e (128 MiB).
            vmem_limit_bytes=48 * 1024 * 1024,
        ),
        # Bandwidth-heavy hint so XLA overlaps neighbors sensibly.
        cost_estimate=pl.CostEstimate(
            flops=int(7 * rows * h),
            transcendentals=int(2 * rows),
            bytes_accessed=int(2 * rows * h * itemsize),
        ),
    )(alpha, bias, x2d)

    return out.reshape(orig_shape)


if __name__ == "__main__":
    key = jax.random.PRNGKey(0)
    batch, seq, hidden = 2, 8, 32
    x = jax.random.normal(key, (batch, seq, hidden), dtype=jnp.float32)

    # Parameters mirroring nn.Parameter(torch.ones(1)) / nn.Parameter(torch.zeros(1))
    alpha = jnp.ones((1,), dtype=jnp.float32)
    bias = jnp.zeros((1,), dtype=jnp.float32)

    out = layer_normalization(x, alpha, bias)
    out = jax.block_until_ready(out)

    # Pure-JAX reference (unbiased std, eps added to std, like torch.std)
    mean = jnp.mean(x, axis=-1, keepdims=True)
    std = jnp.sqrt(jnp.sum((x - mean) ** 2, axis=-1, keepdims=True) / (hidden - 1))
    ref = alpha[0] * (x - mean) / (std + EPSILON) + bias[0]
    assert jnp.allclose(out, ref, atol=1e-5, rtol=1e-5), "mismatch vs reference"

    print("KERNEL_OK")
</pallas_src>

<mosaic_0001>
module attributes {stable_mosaic.version = 11 : i64} {
  func.func @layernorm_kernel(%arg0: i32, %arg1: memref<1xf32, #tpu.memory_space<smem>>, %arg2: memref<1xf32, #tpu.memory_space<smem>>, %arg3: memref<8x32xf32, #tpu.memory_space<vmem>>, %arg4: memref<8x32xf32, #tpu.memory_space<vmem>>) attributes {dimension_semantics = [#tpu.dimension_semantics<parallel>], iteration_bounds = array<i64: 2>, scalar_prefetch = 0 : i64, scratch_operands = 0 : i64, tpu.core_type = #tpu.core_type<tc>, window_params = [{transform_indices = @transform_0, window_bounds = array<i64: 1>}, {transform_indices = @transform_1, window_bounds = array<i64: 1>}, {transform_indices = @transform_2, window_bounds = array<i64: 8, 32>}, {transform_indices = @transform_3, window_bounds = array<i64: 8, 32>}]} {
    %c0 = arith.constant 0 : index
    %c0_0 = arith.constant 0 : index
    %0 = vector.load %arg3[%c0, %c0_0] : memref<8x32xf32, #tpu.memory_space<vmem>>, vector<8x32xf32>
    %cst = arith.constant dense<0.000000e+00> : vector<8xf32>
    %1 = vector.multi_reduction <add>, %0, %cst [1] : vector<8x32xf32> to vector<8xf32>
    %2 = vector.shape_cast %1 : vector<8xf32> to vector<8x1xf32>
    %cst_1 = arith.constant 3.200000e+01 : f32
    %3 = vector.broadcast %cst_1 : f32 to vector<8x1xf32>
    %4 = arith.divf %2, %3 : vector<8x1xf32>
    %5 = vector.broadcast %4 : vector<8x1xf32> to vector<8x32xf32>
    %6 = arith.subf %0, %5 : vector<8x32xf32>
    %7 = arith.mulf %6, %6 : vector<8x32xf32>
    %cst_2 = arith.constant dense<0.000000e+00> : vector<8xf32>
    %8 = vector.multi_reduction <add>, %7, %cst_2 [1] : vector<8x32xf32> to vector<8xf32>
    %9 = vector.shape_cast %8 : vector<8xf32> to vector<8x1xf32>
    %cst_3 = arith.constant 0.0322580636 : f32
    %10 = vector.broadcast %cst_3 : f32 to vector<8x1xf32>
    %11 = arith.mulf %9, %10 : vector<8x1xf32>
    %12 = math.sqrt %11 : vector<8x1xf32>
    %c0_4 = arith.constant 0 : index
    %13 = memref.load %arg1[%c0_4] : memref<1xf32, #tpu.memory_space<smem>>
    %cst_5 = arith.constant 9.99999997E-7 : f32
    %14 = vector.broadcast %cst_5 : f32 to vector<8x1xf32>
    %15 = arith.addf %12, %14 : vector<8x1xf32>
    %16 = vector.broadcast %13 : f32 to vector<8x1xf32>
    %17 = arith.divf %16, %15 : vector<8x1xf32>
    %c0_6 = arith.constant 0 : index
    %18 = memref.load %arg2[%c0_6] : memref<1xf32, #tpu.memory_space<smem>>
    %19 = arith.mulf %4, %17 : vector<8x1xf32>
    %20 = vector.broadcast %18 : f32 to vector<8x1xf32>
    %21 = arith.subf %20, %19 : vector<8x1xf32>
    %22 = vector.broadcast %17 : vector<8x1xf32> to vector<8x32xf32>
    %23 = arith.mulf %0, %22 : vector<8x32xf32>
    %24 = vector.broadcast %21 : vector<8x1xf32> to vector<8x32xf32>
    %25 = arith.addf %23, %24 : vector<8x32xf32>
    %c0_7 = arith.constant 0 : index
    %c0_8 = arith.constant 0 : index
    %26 = vector.load %arg4[%c0_7, %c0_8] : memref<8x32xf32, #tpu.memory_space<vmem>>, vector<8x32xf32>
    tpu.vector_store %arg4[%c0_7, %c0_8], %25 {strides = array<i32>} : memref<8x32xf32, #tpu.memory_space<vmem>>, vector<8x32xf32>,
    return
  }
  func.func @transform_0(%arg0: i32) -> i32 {
    %c0_i32 = arith.constant 0 : i32
    %c0_i32_0 = arith.constant 0 : i32
    return %c0_i32 : i32
  }
  func.func @transform_1(%arg0: i32) -> i32 {
    %c0_i32 = arith.constant 0 : i32
    %c0_i32_0 = arith.constant 0 : i32
    return %c0_i32 : i32
  }
  func.func @transform_2(%arg0: i32) -> (i32, i32) {
    %c0_i32 = arith.constant 0 : i32
    %c0_i32_0 = arith.constant 0 : i32
    return %arg0, %c0_i32 : i32, i32
  }
  func.func @transform_3(%arg0: i32) -> (i32, i32) {
    %c0_i32 = arith.constant 0 : i32
    %c0_i32_0 = arith.constant 0 : i32
    return %arg0, %c0_i32 : i32, i32
  }
}

</mosaic_0001>

<bundles_post_ra>
// kernel: tpu_custom_call.1
= control target key start
LH: loop header
LB: loop body
LE: loop exit
PB: predicated region body
PF: predicated region fallthrough
CT: control target
= control target key end

     0   :  { %s660_s0 = inlined_call_operand.<no memory space> [shape: f32[1], index: 0, kind: input, shape index: {}]   ;;  %s661_s1 = inlined_call_operand.<no memory space> [shape: f32[1], index: 1, kind: input, shape index: {}]   ;;  %s662_s2 = inlined_call_operand.hbm [shape: f32[16,32], index: 2, kind: input, shape index: {}]   ;;  %s663_s3 = inlined_call_operand.hbm [shape: f32[16,32], index: 3, kind: output, shape index: {}]  }
   0x1   :  { %8 = sst [smem:[#allocation2]] %s660_s0 }
   0x2   :  { %9 = sst [smem:[#allocation3]] %s661_s1 }
   0x3   :  { %10 = vsyncpa [#allocation5], 0 }
   0x4   :  { %12 = vsyncpa [#allocation5 + $0x1], 0 }
   0x5   :  { %13 = vsyncpa [#allocation6], 0 }
   0x6   :  { %15 = vsyncpa [#allocation6 + $0x1], 0  ;;  %s492_s16 = smov 0   ;;  %s494_s17 = smov 0  }
   0x7   :  { %s496_s18 = smov 0   ;;  %s498_s19 = smov 0  }
   0x8 LB: > { %s513_s0 = sadd.s32 4294967295, %s462_s19   ;;  %s304_s1 = sadd.s32 4294967294, %s462_s19   ;;  %s462_s19 = sphi %s498_s19, %s678_s19   ;;  %s458_s18 = sphi %s496_s18, %s677_s18   ;;  %s454_s17 = sphi %s494_s17, %s676_s17   ;;  %s450_s16 = sphi %s492_s16, %s675_s16  }
   0x9   : > { %s517_s20 = sadd.s32 1, %s462_s19   ;;  %s70_s21 = sadd.s32 1, %s458_s18 }
   0xa   : > { %s67_s22 = ssub.s32 %s462_s19, %s517_s20  ;;  %p77_p0 = scmp.ne.s32.totalorder %s458_s18, %s454_s17 }
   0xb   : > { %p68_p1 = scmp.eq.s32.totalorder %s67_s22, 0  ;;  %p78_p2 = scmp.eq.s32.totalorder %s462_s19, 0 }
   0xc   : > { %p83_p3 = scmp.ne.s32.totalorder %s454_s17, %s450_s16  ;;  %p84_p4 = scmp.eq.s32.totalorder %s513_s0, 0 }
   0xd   : > { %s529_s23 = scalar_select %p68_p1, %s458_s18, %s70_s21  }
   0xe   : > { %p531_p5 = por %p78_p2, %p77_p0  ;;  %p535_p6 = por %p84_p4, %p83_p3 }
   0xf   : > { %p107_p7 = scmp.eq.s32.totalorder %s513_s0, 1  ;;  %p113_p8 = scmp.eq.s32.totalorder %s304_s1, 1 }
  0x10   : > { %p328_p10 = scmp.lt.s32.totalorder %s462_s19, 2  ;;  %s139_s28 = sand.u32 1, %s458_s18  }
  0x11   : > { %p542_p11 = por %p107_p7, %p77_p0  ;;  %p546_p12 = por %p113_p8, %p83_p3 }
  0x12   : > { %s308_s29 = sshll.u32 %s462_s19, 7  ;;  %s307_s30 = sshll.u32 %s139_s28, 3 }
  0x13   : > { %s667_s26 = scalar_select %p542_p11, 1, 0 }
  0x14   : > { %s668_s27 = scalar_select %p546_p12, 1, 0 }
  0x15   : > { %s555_s6 = scalar_lea.hbm %s662_s2, %s308_s29  ;;  %s143_s7 = scalar_lea.vmem [#allocation4], %s307_s30 }
  0x16   : > { %s150_s8 = sshll.u32 %s143_s7, 4  ;;  %p559_p13 = pnand %p328_p10, %p531_p5  ;;  %s563_s8 = int_to_ptr.vmem [resolvable:$true] %s150_s8 }
  0x17   : > { %s140_s10 = scalar_lea.sflag [#allocation5], %s139_s28  ;;  %s366_s11 = scalar_lea.hbm %s555_s6, 128 }
  0x18   : > { %p367_p2 = scmp.ne.s32.totalorder %s555_s6, %s366_s11  ;;  %p368_p3 = pneg %p559_p13 }
  0x19   : > { %s371_s14 = scalar_lea.hbm %s662_s2, 256  ;;  %p372_p5 = scmp.lt.u32.totalorder %s555_s6, %s662_s2 }
  0x1a   : > { %p369_p4 = pnand %p368_p3, %p367_p2  ;;  %p373_p8 = scmp.lt.u32.totalorder %s371_s14, %s366_s11 }
  0x1b   : > { %p375_p9 = scmp.lt.u32.totalorder %s366_s11, %s555_s6 }
  0x1c   : > { %p370_p7 = pneg %p369_p4  ;;  %p374_p10 = por %p373_p8, %p372_p5 }
  0x1e   : > { %p376_p0 = por %p375_p9, %p374_p10 }
  0x20   : > { %p377_p1 = pnand %p376_p0, %p370_p7 }
  0x22   : > { %380 = shalt.err (!%p377_p1)
}
  0x23   : > { %s381_s21 = scalar_lea.vmem %s563_s8, 128  ;;  %s464_s22 = smov [#allocation4]  }
  0x24   : > { %p382_p2 = scmp.ne.s32.totalorder %s563_s8, %s381_s21  ;;  %s386_s24 = sshll.u32 %s464_s22, 4  ;;  %s387_s24 = int_to_ptr.vmem [resolvable:$false] %s386_s24 }
  0x25   : > { %s388_s28 = scalar_lea.vmem %s387_s24, 256  ;;  %p389_p11 = scmp.lt.s32.totalorder %s563_s8, %s387_s24 }
  0x26   : > { %p384_p4 = pnand %p382_p2, %p368_p3  ;;  %p390_p5 = scmp.lt.s32.totalorder %s388_s28, %s381_s21 }
  0x28   : > { %p385_p12 = pneg %p384_p4  ;;  %p391_p8 = por %p390_p5, %p389_p11 }
  0x2a   : > { %p392_p9 = pnand %p391_p8, %p385_p12 }
  0x2c   : > { %395 = shalt.err (!%p392_p9)
}
  0x2d   : > { %323 = dma.hbm_to_vmem [thread:$0]  (!%p559_p13), %s555_s6, 128, %s563_s8, %s140_s10  }
  0x2e   : > { %p670_p0 = scmp.lt.s32.totalorder %s462_s19, 3  ;;  %p671_p1 = scmp.ge.s32.totalorder %s462_s19, 1 }
  0x30   : > { %p156_p3 = pnand %p671_p1, %p670_p0 }
  0x31   : > { %s597_s29 = sand.u32 (!%p156_p3), 1, %s454_s17  }
  0x32   : > { %159 = sbr.rel (%p156_p3) target bundleno = 403 (0x193), region = 32  ;;  %s310_s30 = sshll.u32 (!%p156_p3), %s597_s29, 3 }
  0x33   : > { %s162_s4 = scalar_lea.sflag (!%p156_p3), [#allocation5], %s597_s29  ;;  %s165_s5 = scalar_lea.vmem (!%p156_p3), [#allocation4], %s310_s30 }
  0x39   : > { %441 = dma.done.wait (%p535_p6), %s162_s4, 128  }
  0x3a   : > { %443 = vsyncadd (%p535_p6), %s162_s4, 4294967168  ;;  %vm189_vm0 = vcmask 261120   ;;  %v188_v0 = vld [vmem:[%s165_s5] sm:$0xff]  ;;  %s208_s25 = sld [smem:[#allocation2]]  ;;  %s313_s7 = sshll.u32 %s513_s0, 7 }
  0x3b   : > { %v190_v1 = vsel %vm189_vm0, %v188_v0, 0.0  ;;  %s213_s6 = sld [smem:[#allocation3]]  ;;  %s187_s8 = scalar_lea.vmem [#allocation7], %s310_s30 }
  0x3c   : > { %191 = vadd.xlane.f32.xlu0 %v190_v1  ;;  %s234_s9 = sshll.u32 %s187_s8, 4  ;;  %s615_s12 = scalar_lea.hbm %s663_s3, %s313_s7  ;;  %s617_s9 = int_to_ptr.vmem [resolvable:$true] %s234_s9 }
  0x3d   : > { %s221_s13 = scalar_lea.sflag [#allocation6], %s597_s29  ;;  %s396_s0 = scalar_lea.vmem %s617_s9, 128 }
  0x3e   : > { %p397_p6 = scmp.ne.s32.totalorder %s617_s9, %s396_s0  ;;  %p672_p11 = scmp.ne.s32.totalorder %s667_s26, 0 }
  0x3f   : > { %s465_s14 = smov [#allocation7]  }
  0x40   : > { %v210_v15 = vstv %s208_s25  ;;  %p398_p12 = pnand %p397_p6, %p672_p11  ;;  %s400_s15 = sshll.u32 %s465_s14, 4  ;;  %s401_s15 = int_to_ptr.vmem [resolvable:$false] %s400_s15 }
  0x41   : > { %v215_v18 = vstv %s213_s6  ;;  %s402_s1 = scalar_lea.vmem %s401_s15, 256  ;;  %p403_p7 = scmp.lt.s32.totalorder %s617_s9, %s401_s15 }
  0x42   : > { %p399_p13 = pneg %p398_p12  ;;  %p404_p10 = scmp.lt.s32.totalorder %s402_s1, %s396_s0 }
  0x44   : > { %p405_p2 = por %p404_p10, %p403_p7 }
  0x46   : > { %p406_p4 = pnand %p405_p2, %p399_p13 }
  0xc9   : > { %v192_v2 = vpop.xlane.xlu0 %191 }
  0xca   : > { %v194_v3 = vmul.f32 0.03125, %v192_v2 }
  0xcc   : > { %v195_v4 = vsub.f32 %v188_v0, %v194_v3 }
  0xce   : > { %v196_v5 = vmul.f32 %v195_v4, %v195_v4 }
  0xd0   : > { %v197_v6 = vsel %vm189_vm0, %v196_v5, 0.0 }
  0xd1   : > { %198 = vadd.xlane.f32.xlu0 %v197_v6 }
 0x15e   : > { %v199_v7 = vpop.xlane.xlu0 %198 }
 0x15f   : > { %v200_v8 = vmul.f32 0.032258064, %v199_v7 }
 0x161   : > { %362 = vrsqrt.f32 %v200_v8  ;;  %vm203_vm1 = vcmp.eq.f32.partialorder %v200_v8, inf  ;;  %v206_v11 = vand.u32 2147483648, %v200_v8  ;;  %vm205_vm2 = vcmp.eq.f32.partialorder %v200_v8, 0.0 }
 0x16b   : > { %v363_v9 = vpop.eup %362 }
 0x16c   : > { %v202_v10 = vmul.f32 %v363_v9, %v200_v8 }
 0x16e   : > { %v204_v12 = vsel %vm203_vm1, %v200_v8, %v202_v10 }
 0x16f   : > { %v207_v13 = vsel %vm205_vm2, %v206_v11, %v204_v12 }
 0x170   : > { %v209_v14 = vadd.f32 1e-06, %v207_v13 }
 0x172   : > { %364 = vrcp.f32 %v209_v14 }
 0x17c   : > { %v365_v16 = vpop.eup %364 }
 0x17d   : > { %v212_v17 = vmul.f32 %v365_v16, %v210_v15 }
 0x17f   : > { %v214_v19 = vmul.f32 %v212_v17, %v194_v3  ;;  %v217_v21 = vmul.f32 %v212_v17, %v188_v0 }
 0x181   : > { %v216_v20 = vsub.f32 %v215_v18, %v214_v19 }
 0x183   : > { %v218_v22 = vadd.f32 %v217_v21, %v216_v20 }
 0x185   : > { %219 = vst.msk [vmem:[%s187_s8] sm:$0xff] %vm189_vm0, %v218_v22 }
 0x186   : > { %409 = shalt.err (!%p406_p4)
}
 0x187   : > { %s410_s21 = scalar_lea.hbm %s615_s12, 128  ;;  %s414_s28 = scalar_lea.hbm %s663_s3, 256 }
 0x188   : > { %p411_p5 = scmp.ne.s32.totalorder %s615_s12, %s410_s21  ;;  %p415_p0 = scmp.lt.u32.totalorder %s615_s12, %s663_s3 }
 0x189   : > { %p416_p1 = scmp.lt.u32.totalorder %s414_s28, %s410_s21  ;;  %p418_p6 = scmp.lt.u32.totalorder %s410_s21, %s615_s12 }
 0x18a   : > { %p412_p8 = pnand %p411_p5, %p672_p11 }
 0x18b   : > { %p417_p3 = por %p416_p1, %p415_p0 }
 0x18c   : > { %p413_p9 = pneg %p412_p8 }
 0x18d   : > { %p419_p12 = por %p418_p6, %p417_p3 }
 0x18f   : > { %p420_p13 = pnand %p419_p12, %p413_p9 }
 0x191   : > { %423 = shalt.err (!%p420_p13)
}
 0x192   : > { %318 = dma.vmem_to_hbm [thread:$0]  (%p672_p11), %s617_s9, 128, %s615_s12, %s221_s13  }
 0x193 PF: > { %s246_s4 = sand.u32 1, %s450_s16   ;;  %p673_p7 = scmp.ne.s32.totalorder %s668_s27, 0 }
 0x194   : > { %p674_p10 = scmp.ge.s32.totalorder %s462_s19, 2  ;;  %s247_s5 = scalar_lea.sflag [#allocation6], %s246_s4 }
 0x196   : > { %p325_p2 = pnand %p674_p10, %p673_p7 }
 0x198   : > { %445 = dma.done.wait (!%p325_p2), %s247_s5, 128  }
 0x199   : > { %447 = vsyncadd (!%p325_p2), %s247_s5, 4294967168  ;;  %p18_p4 = scmp.ge.s32.totalorder %s517_s20, 4   ;;  %s675_s16 = smov %s454_s17 }
 0x19a   : > { %s676_s17 = smov %s458_s18  ;;  %s677_s18 = smov %s529_s23 }
 0x19b   : > { %s678_s19 = smov %s517_s20  ;;  %20 = sbr.rel (!%p18_p4) target bundleno = 8 (0x8), region = 77 }
 0x1a2   :  { %252 = vsyncpa [#allocation5], 1 }
 0x1a3   :  { %254 = vsyncpa [#allocation5 + $0x1], 1 }
 0x1a4   :  { %255 = vsyncpa [#allocation6], 1 }
 0x1a5   :  { %257 = vsyncpa [#allocation6 + $0x1], 1 }

</bundles_post_ra>
